<compile_context>
chip_gen: v7x
topology: tpu7x:2x2x1
jax: 0.10.0
libtpu: 0.0.40
codegen_flags: <defaults>
</compile_context>

<pallas_src>
import math

import jax
import jax.numpy as jnp
from jax.experimental import pallas as pl
from jax.experimental.pallas import tpu as pltpu


# ---------------------------------------------------------------------------
# Kernel
# ---------------------------------------------------------------------------
def _make_kernel(*, pw: float, pb: float, use_wmask: bool, use_bmask: bool):
    """Builds the kernel body; arg layout depends on which masks are present.

    Ref order: x, wT, [wmask], bias, [bmask], out, acc_scratch
    """
    w_scale = 1.0 / (1.0 - pw) if use_wmask else 1.0
    b_scale = 1.0 / (1.0 - pb) if use_bmask else 1.0

    def kernel(*refs):
        idx = 0
        x_ref = refs[idx]; idx += 1
        w_ref = refs[idx]; idx += 1
        wm_ref = None
        if use_wmask:
            wm_ref = refs[idx]; idx += 1
        b_ref = refs[idx]; idx += 1
        bm_ref = None
        if use_bmask:
            bm_ref = refs[idx]; idx += 1
        o_ref = refs[idx]; idx += 1
        acc_ref = refs[idx]

        k = pl.program_id(2)

        @pl.when(k == 0)
        def _init():
            acc_ref[...] = jnp.zeros_like(acc_ref)

        w = w_ref[...]                      # [tk, tn] -- already [K, N] layout
        if use_wmask:
            # 0/1 keep-mask; the 1/(1-pw) scale is folded into the epilogue.
            w = w * wm_ref[...]

        # MXU matmul, contracting the last dim of x with the first dim of w:
        # no transpose needed, f32 accumulation.
        acc_ref[...] += jnp.dot(x_ref[...], w,
                                preferred_element_type=jnp.float32)

        @pl.when(k == pl.num_programs(2) - 1)
        def _finalize():
            acc = acc_ref[...]
            if use_wmask:
                acc = acc * w_scale         # single tm*tn multiply
            b = b_ref[...].astype(jnp.float32)
            if use_bmask:
                b = b * bm_ref[...].astype(jnp.float32) * b_scale
            o_ref[...] = (acc + b).astype(o_ref.dtype)

    return kernel


# ---------------------------------------------------------------------------
# Wrapper
# ---------------------------------------------------------------------------
def _pick_tile(dim: int, preferred: int, align: int) -> int:
    """Largest align-multiple tile <= preferred that divides dim."""
    if dim <= preferred:
        return dim
    t = (preferred // align) * align
    while t >= align:
        if dim % t == 0:
            return t
        t -= align
    return dim  # fall back to the whole (un-tiled) dimension


def sparse_connected_layer(x, weight, bias, key, *, pw=0.2, pb=0.2,
                           training=True, tm=None, tn=None, tk=None,
                           compute_dtype=None):
    """DropConnect linear layer.

    x: [M, K], weight: [N, K] (PyTorch layout), bias: [N] or None,
    key: jax PRNG key used for the dropout masks when training.
    """
    M, K = x.shape
    N, K2 = weight.shape
    assert K == K2, "in_features mismatch"
    assert 0.0 <= pw < 1.0 and 0.0 <= pb < 1.0, "dropout prob must be in [0,1)"

    out_dtype = x.dtype

    # Pre-transpose ONCE so the kernel sees a [K, N] RHS (no in-kernel w.T).
    w_t = weight.T                                   # [K, N]

    if bias is None:
        bias = jnp.zeros((N,), dtype=out_dtype)
        pb = 0.0
    b2 = bias.reshape(1, N)

    if compute_dtype is not None:                    # e.g. bf16 on v6e/v7x
        x = x.astype(compute_dtype)
        w_t = w_t.astype(compute_dtype)

    use_wmask = bool(training) and pw > 0.0
    use_bmask = bool(training) and pb > 0.0

    kw, kb = jax.random.split(key)
    args = [x, w_t]
    if use_wmask:
        args.append(jax.random.bernoulli(kw, 1.0 - pw, (K, N)).astype(w_t.dtype))
    args.append(b2)
    if use_bmask:
        args.append(jax.random.bernoulli(kb, 1.0 - pb, (1, N)).astype(b2.dtype))

    # Tile selection: lane dim (tn) and contraction dim (tk) 128-aligned,
    # M-tile 8-aligned.  Defaults target the v6e/v7x 256x256 MXU; sweep per
    # generation in production (smaller on v5e, VMEM-aware on v7x).
    tm = _pick_tile(M, 256, 8) if tm is None else tm
    tn = _pick_tile(N, 256, 128) if tn is None else tn
    tk = _pick_tile(K, 512, 128) if tk is None else tk
    assert M % tm == 0 and N % tn == 0 and K % tk == 0

    grid = (M // tm, N // tn, K // tk)

    in_specs = [
        pl.BlockSpec((tm, tk), lambda i, j, k: (i, k)),   # x
        pl.BlockSpec((tk, tn), lambda i, j, k: (k, j)),   # weight (K,N)
    ]
    if use_wmask:
        in_specs.append(pl.BlockSpec((tk, tn), lambda i, j, k: (k, j)))
    in_specs.append(pl.BlockSpec((1, tn), lambda i, j, k: (0, j)))  # bias
    if use_bmask:
        in_specs.append(pl.BlockSpec((1, tn), lambda i, j, k: (0, j)))

    out_spec = pl.BlockSpec((tm, tn), lambda i, j, k: (i, j))

    kernel = _make_kernel(pw=float(pw), pb=float(pb),
                          use_wmask=use_wmask, use_bmask=use_bmask)

    return pl.pallas_call(
        kernel,
        out_shape=jax.ShapeDtypeStruct((M, N), out_dtype),
        grid_spec=pltpu.PrefetchScalarGridSpec(
            num_scalar_prefetch=0,
            grid=grid,
            in_specs=in_specs,
            out_specs=out_spec,
            scratch_shapes=[pltpu.VMEM((tm, tn), jnp.float32)],
        ),
        compiler_params=pltpu.CompilerParams(
            dimension_semantics=("parallel", "parallel", "arbitrary"),
            vmem_limit_bytes=64 * 1024 * 1024,
        ),
    )(*args)


# ---------------------------------------------------------------------------
# Init (mimics nn.Linear / kaiming_uniform_(a=sqrt(5)))
# ---------------------------------------------------------------------------
def _init_params(key, in_features, out_features, dtype=jnp.float32):
    kw, kb = jax.random.split(key)
    bound = 1.0 / math.sqrt(in_features)
    weight = jax.random.uniform(kw, (out_features, in_features),
                                minval=-bound, maxval=bound, dtype=dtype)
    bias = jax.random.uniform(kb, (out_features,),
                              minval=-bound, maxval=bound, dtype=dtype)
    return weight, bias


# ---------------------------------------------------------------------------
# Demo / self-check
# ---------------------------------------------------------------------------
if __name__ == "__main__":
    in_features = 256
    out_features = 256
    batch = 16
    pw, pb = 0.2, 0.2

    key = jax.random.PRNGKey(0)
    kx, kp, kdrop = jax.random.split(key, 3)
    x = jax.random.normal(kx, (batch, in_features), dtype=jnp.float32)
    weight, bias = _init_params(kp, in_features, out_features)

    # Training-mode forward (DropConnect active).  Explicit 128-tiles so the
    # demo exercises the multi-tile grid (1, 2, 2) and K accumulation.
    y_train = sparse_connected_layer(x, weight, bias, kdrop,
                                     pw=pw, pb=pb, training=True,
                                     tm=batch, tn=128, tk=128)
    jax.block_until_ready(y_train)

    # Reference for training mode: rebuild the exact same masks the wrapper
    # generated (same key-split order) and apply them in pure JAX.
    kw_m, kb_m = jax.random.split(kdrop)
    wmask = jax.random.bernoulli(kw_m, 1.0 - pw,
                                 (in_features, out_features)).astype(jnp.float32)
    bmask = jax.random.bernoulli(kb_m, 1.0 - pb,
                                 (1, out_features)).astype(jnp.float32)
    w_dropped = (weight.T * wmask) / (1.0 - pw)
    b_dropped = (bias[None, :] * bmask) / (1.0 - pb)
    y_train_ref = x @ w_dropped + b_dropped
    assert y_train.shape == (batch, out_features)
    assert jnp.allclose(y_train, y_train_ref, atol=3e-2, rtol=3e-2), \
        "training-mode mismatch"

    # Eval-mode forward (plain linear).
    y_eval = sparse_connected_layer(x, weight, bias, kdrop,
                                    pw=pw, pb=pb, training=False,
                                    tm=batch, tn=128, tk=128)
    jax.block_until_ready(y_eval)
    y_eval_ref = x @ weight.T + bias[None, :]
    assert jnp.allclose(y_eval, y_eval_ref, atol=3e-2, rtol=3e-2), \
        "eval-mode mismatch"

    print("KERNEL_OK")
</pallas_src>

<mosaic_0001>
module attributes {stable_mosaic.version = 11 : i64} {
  func.func @kernel(%arg0: i32, %arg1: i32, %arg2: i32, %arg3: memref<16x128xf32, #tpu.memory_space<vmem>>, %arg4: memref<128x128xf32, #tpu.memory_space<vmem>>, %arg5: memref<128x128xf32, #tpu.memory_space<vmem>>, %arg6: memref<1x128xf32, #tpu.memory_space<vmem>>, %arg7: memref<1x128xf32, #tpu.memory_space<vmem>>, %arg8: memref<16x128xf32, #tpu.memory_space<vmem>>, %arg9: memref<16x128xf32, #tpu.memory_space<vmem>>) attributes {dimension_semantics = [#tpu.dimension_semantics<parallel>, #tpu.dimension_semantics<parallel>, #tpu.dimension_semantics<arbitrary>], iteration_bounds = array<i64: 1, 2, 2>, scalar_prefetch = 0 : i64, scratch_operands = 1 : i64, tpu.core_type = #tpu.core_type<tc>, window_params = [{transform_indices = @transform_0, window_bounds = array<i64: 16, 128>}, {transform_indices = @transform_1, window_bounds = array<i64: 128, 128>}, {transform_indices = @transform_2, window_bounds = array<i64: 128, 128>}, {transform_indices = @transform_3, window_bounds = array<i64: 1, 128>}, {transform_indices = @transform_4, window_bounds = array<i64: 1, 128>}, {transform_indices = @transform_5, window_bounds = array<i64: 16, 128>}]} {
    %c0_i32 = arith.constant 0 : i32
    %0 = arith.cmpi eq, %arg2, %c0_i32 : i32
    %1 = arith.extui %0 : i1 to i32
    %c0_i32_0 = arith.constant 0 : i32
    %2 = arith.cmpi ne, %1, %c0_i32_0 : i32
    scf.if %2 {
      %cst_11 = arith.constant 0.000000e+00 : f32
      %14 = vector.broadcast %cst_11 : f32 to vector<16x128xf32>
      %c0_12 = arith.constant 0 : index
      %c0_13 = arith.constant 0 : index
      %15 = vector.load %arg9[%c0_12, %c0_13] : memref<16x128xf32, #tpu.memory_space<vmem>>, vector<16x128xf32>
      tpu.vector_store %arg9[%c0_12, %c0_13], %14 {strides = array<i32>} : memref<16x128xf32, #tpu.memory_space<vmem>>, vector<16x128xf32>,
    } else {
    }
    %c0 = arith.constant 0 : index
    %c0_1 = arith.constant 0 : index
    %3 = vector.load %arg4[%c0, %c0_1] : memref<128x128xf32, #tpu.memory_space<vmem>>, vector<128x128xf32>
    %c0_2 = arith.constant 0 : index
    %c0_3 = arith.constant 0 : index
    %4 = vector.load %arg5[%c0_2, %c0_3] : memref<128x128xf32, #tpu.memory_space<vmem>>, vector<128x128xf32>
    %5 = arith.mulf %3, %4 : vector<128x128xf32>
    %c0_4 = arith.constant 0 : index
    %c0_5 = arith.constant 0 : index
    %6 = vector.load %arg9[%c0_4, %c0_5] : memref<16x128xf32, #tpu.memory_space<vmem>>, vector<16x128xf32>
    %c0_6 = arith.constant 0 : index
    %c0_7 = arith.constant 0 : index
    %7 = vector.load %arg3[%c0_6, %c0_7] : memref<16x128xf32, #tpu.memory_space<vmem>>, vector<16x128xf32>
    %cst = arith.constant dense<0.000000e+00> : vector<16x128xf32>
    %8 = tpu.matmul %7, %5, %cst {dimension_numbers = #tpu.dot_dimension_numbers<[1], [0], [0], [1], [0, 0, 1, 1], [], []>} : vector<16x128xf32>, vector<128x128xf32>, vector<16x128xf32> -> vector<16x128xf32>
    %9 = arith.addf %6, %8 : vector<16x128xf32>
    %c0_8 = arith.constant 0 : index
    %c0_9 = arith.constant 0 : index
    %10 = vector.load %arg9[%c0_8, %c0_9] : memref<16x128xf32, #tpu.memory_space<vmem>>, vector<16x128xf32>
    tpu.vector_store %arg9[%c0_8, %c0_9], %9 {strides = array<i32>} : memref<16x128xf32, #tpu.memory_space<vmem>>, vector<16x128xf32>,
    %c1_i32 = arith.constant 1 : i32
    %11 = arith.cmpi eq, %arg2, %c1_i32 : i32
    %12 = arith.extui %11 : i1 to i32
    %c0_i32_10 = arith.constant 0 : i32
    %13 = arith.cmpi ne, %12, %c0_i32_10 : i32
    scf.if %13 {
      %c0_11 = arith.constant 0 : index
      %c0_12 = arith.constant 0 : index
      %14 = vector.load %arg9[%c0_11, %c0_12] : memref<16x128xf32, #tpu.memory_space<vmem>>, vector<16x128xf32>
      %cst_13 = arith.constant 1.250000e+00 : f32
      %15 = vector.broadcast %cst_13 : f32 to vector<16x128xf32>
      %16 = arith.mulf %14, %15 : vector<16x128xf32>
      %c0_14 = arith.constant 0 : index
      %c0_15 = arith.constant 0 : index
      %17 = vector.load %arg6[%c0_14, %c0_15] : memref<1x128xf32, #tpu.memory_space<vmem>>, vector<1x128xf32>
      %c0_16 = arith.constant 0 : index
      %c0_17 = arith.constant 0 : index
      %18 = vector.load %arg7[%c0_16, %c0_17] : memref<1x128xf32, #tpu.memory_space<vmem>>, vector<1x128xf32>
      %19 = arith.mulf %17, %18 : vector<1x128xf32>
      %cst_18 = arith.constant 1.250000e+00 : f32
      %20 = vector.broadcast %cst_18 : f32 to vector<1x128xf32>
      %21 = arith.mulf %19, %20 : vector<1x128xf32>
      %22 = vector.broadcast %21 : vector<1x128xf32> to vector<16x128xf32>
      %23 = arith.addf %16, %22 : vector<16x128xf32>
      %c0_19 = arith.constant 0 : index
      %c0_20 = arith.constant 0 : index
      %24 = vector.load %arg8[%c0_19, %c0_20] : memref<16x128xf32, #tpu.memory_space<vmem>>, vector<16x128xf32>
      tpu.vector_store %arg8[%c0_19, %c0_20], %23 {strides = array<i32>} : memref<16x128xf32, #tpu.memory_space<vmem>>, vector<16x128xf32>,
    } else {
    }
    return
  }
  func.func @transform_0(%arg0: i32, %arg1: i32, %arg2: i32) -> (i32, i32) {
    %c0_i32 = arith.constant 0 : i32
    return %arg0, %arg2 : i32, i32
  }
  func.func @transform_1(%arg0: i32, %arg1: i32, %arg2: i32) -> (i32, i32) {
    %c0_i32 = arith.constant 0 : i32
    return %arg2, %arg1 : i32, i32
  }
  func.func @transform_2(%arg0: i32, %arg1: i32, %arg2: i32) -> (i32, i32) {
    %c0_i32 = arith.constant 0 : i32
    return %arg2, %arg1 : i32, i32
  }
  func.func @transform_3(%arg0: i32, %arg1: i32, %arg2: i32) -> (i32, i32) {
    %c0_i32 = arith.constant 0 : i32
    %c0_i32_0 = arith.constant 0 : i32
    return %c0_i32, %arg1 : i32, i32
  }
  func.func @transform_4(%arg0: i32, %arg1: i32, %arg2: i32) -> (i32, i32) {
    %c0_i32 = arith.constant 0 : i32
    %c0_i32_0 = arith.constant 0 : i32
    return %c0_i32, %arg1 : i32, i32
  }
  func.func @transform_5(%arg0: i32, %arg1: i32, %arg2: i32) -> (i32, i32) {
    %c0_i32 = arith.constant 0 : i32
    return %arg0, %arg1 : i32, i32
  }
}

</mosaic_0001>

<bundles_post_ra>
// kernel: tpu_custom_call.1
= control target key start
LH: loop header
LB: loop body
LE: loop exit
PB: predicated region body
PF: predicated region fallthrough
CT: control target
= control target key end

     0   :  { %s1941_s0 = inlined_call_operand.hbm [shape: f32[16,256], index: 0, kind: input, shape index: {}]   ;;  %s1942_s1 = inlined_call_operand.hbm [shape: f32[256,256], index: 1, kind: input, shape index: {}]   ;;  %s1943_s2 = inlined_call_operand.hbm [shape: f32[256,256], index: 2, kind: input, shape index: {}]   ;;  %s1944_s3 = inlined_call_operand.hbm [shape: f32[1,256], index: 3, kind: input, shape index: {}]   ;;  %s1945_s4 = inlined_call_operand.hbm [shape: f32[1,256], index: 4, kind: input, shape index: {}]   ;;  %s1946_s5 = inlined_call_operand.hbm [shape: f32[16,256], index: 5, kind: output, shape index: {}]  }
   0x1   :  { %1982 = sst [smem:[#allocation32_spill]] %s1941_s0 }
   0x2   :  { %1983 = sst [smem:[#allocation33_spill]] %s1942_s1 }
   0x3   :  { %1984 = sst [smem:[#allocation34_spill]] %s1943_s2 }
   0x4   :  { %1985 = sst [smem:[#allocation35_spill]] %s1944_s3 }
   0x5   :  { %1986 = sst [smem:[#allocation36_spill]] %s1946_s5 }
   0x6   :  { %10 = vsyncpa [#allocation4], 0 }
   0x7   :  { %12 = vsyncpa [#allocation4 + $0x1], 0 }
   0x8   :  { %13 = vsyncpa [#allocation7], 0 }
   0x9   :  { %15 = vsyncpa [#allocation7 + $0x1], 0 }
   0xa   :  { %16 = vsyncpa [#allocation10], 0 }
   0xb   :  { %18 = vsyncpa [#allocation10 + $0x1], 0 }
   0xc   :  { %19 = vsyncpa [#allocation5], 0 }
   0xd   :  { %21 = vsyncpa [#allocation5 + $0x1], 0  ;;  %s1388_s18 = smov 0   ;;  %s1390_s19 = smov 0  }
   0xe   :  { %s1392_s20 = smov 0   ;;  %s1394_s21 = smov 0  }
   0xf   :  { %s1396_s22 = smov 0   ;;  %s1398_s23 = smov 0  }
  0x10   :  { %s1400_s24 = smov 0   ;;  %s1402_s25 = smov 0  }
  0x11   :  { %s1404_s26 = smov 0   ;;  %s1406_s27 = smov 0  }
  0x12   :  { %s1408_s28 = smov 0   ;;  %s1410_s29 = smov 0  }
  0x13   :  { %s1412_s30 = smov 0   ;;  %s1414_s6 = smov 0  }
  0x14 LB: > { %1987 = sst [smem:[#allocation17_spill]] %s1291_s18  ;;  %s1947_s7 = sadd.s32 1, %s1335_s29  ;;  %s1343_s6 = sphi %s1414_s6, %s27_s6   ;;  %s1339_s30 = sphi %s1412_s30, %s2071_s30   ;;  %s1335_s29 = sphi %s1410_s29, %s2063_s29   ;;  %s1331_s28 = sphi %s1408_s28, %s2062_s28   ;;  %s1327_s27 = sphi %s1406_s27, %s2061_s27   ;;  %s1323_s26 = sphi %s1404_s26, %s2060_s26   ;;  %s1319_s25 = sphi %s1402_s25, %s2070_s25   ;;  %s1315_s24 = sphi %s1400_s24, %s2069_s24   ;;  %s1311_s23 = sphi %s1398_s23, %s2058_s23   ;;  %s1307_s22 = sphi %s1396_s22, %s2068_s22   ;;  %s1303_s21 = sphi %s1394_s21, %s2067_s21   ;;  %s1299_s20 = sphi %s1392_s20, %s2066_s20   ;;  %s1295_s19 = sphi %s1390_s19, %s2065_s19   ;;  %s1291_s18 = sphi %s1388_s18, %s2055_s18  }
  0x15   : > { %1988 = sst [smem:[#allocation18_spill]] %s1295_s19  ;;  %p1952_p0 = scmp.eq.s32.totalorder %s1343_s6, 0 }
  0x16   : > { %1989 = sst [smem:[#allocation19_spill]] %s1311_s23  ;;  %p1462_p1 = scmp.ge.s32.totalorder %s1947_s7, 2 }
  0x17   : > { %1990 = sst [smem:[#allocation20_spill]] %s1323_s26  ;;  %p90_p2 = scmp.ne.s32.totalorder %s1311_s23, %s1307_s22 }
  0x18   : > { %1991 = sst [smem:[#allocation21_spill]] %s1327_s27  ;;  %p1951_p4 = scmp.lt.s32.totalorder %s1343_s6, 4 }
  0x19   : > { %1992 = sst [smem:[#allocation22_spill]] %s1331_s28  ;;  %p92_p5 = por %p90_p2, %p1952_p0 }
  0x1a   : > { %1993 = sst [smem:[#allocation23_spill]] %s1335_s29  ;;  %s253_s11 = sand.u32 1, %s1311_s23  }
  0x1b   : > { %1994 = sst [smem:[#allocation24_spill]] %s1339_s30  ;;  %s778_s12 = sshll.u32 %s253_s11, 7 }
  0x1c   : > { %s799_s13 = sshll.u32 %s1335_s29, 5  ;;  %s255_s15 = scalar_lea.vmem [#allocation6], %s778_s12 }
  0x1d   : > { %s261_s14 = sadd.s32 %s1339_s30, %s799_s13  ;;  %s264_s16 = sshll.u32 %s255_s15, 4  ;;  %s1478_s16 = int_to_ptr.vmem [resolvable:$true] %s264_s16 }
  0x1e   : > { %s781_s17 = sshll.u32 %s261_s14, 7  ;;  %s1996_s1 = sld [smem:[#allocation33_spill]] }
  0x1f   : > { %p1487_p6 = pnand %p1951_p4, %p92_p5  ;;  %s1998_s2 = sld [smem:[#allocation34_spill]] }
  0x20   : > { %s278_s15 = scalar_lea.vmem [#allocation8], %s778_s12  ;;  %s1999_s7 = sand.u32 1, %s1343_s6  }
  0x21   : > { %s1496_s5 = sshll.u32 %s278_s15, 4  ;;  %s1500_s28 = scalar_lea.sflag [#allocation7], %s1999_s7  ;;  %s1532_s5 = int_to_ptr.vmem [resolvable:$true] %s1496_s5 }
  0x22   : > { %p1955_p8 = pneg %p1487_p6 }
  0x24   : > { %s1483_s9 = scalar_lea.hbm %s1996_s1, %s781_s17  ;;  %s1044_s13 = scalar_lea.hbm %s1996_s1, 8192 }
  0x25   : > { %s1494_s14 = scalar_lea.hbm %s1998_s2, %s781_s17  ;;  %s1039_s27 = scalar_lea.hbm %s1483_s9, 2048 }
  0x26   : > { %p1040_p7 = scmp.ne.s32.totalorder %s1483_s9, %s1039_s27  ;;  %p1045_p11 = scmp.lt.u32.totalorder %s1483_s9, %s1996_s1 }
  0x27   : > { %p1046_p12 = scmp.lt.u32.totalorder %s1044_s13, %s1039_s27  ;;  %p1048_p2 = scmp.lt.u32.totalorder %s1039_s27, %s1483_s9 }
  0x28   : > { %p1042_p9 = pnand %p1955_p8, %p1040_p7 }
  0x29   : > { %p1047_p13 = por %p1046_p12, %p1045_p11 }
  0x2a   : > { %p1043_p10 = pneg %p1042_p9 }
  0x2b   : > { %p1049_p5 = por %p1048_p2, %p1047_p13 }
  0x2d   : > { %p1050_p4 = pnand %p1049_p5, %p1043_p10 }
  0x2f   : > { %1053 = shalt.err (!%p1050_p4)
}
  0x30   : > { %s1054_s12 = scalar_lea.vmem %s1478_s16, 2048  ;;  %s1345_s0 = smov [#allocation6]  }
  0x31   : > { %p1055_p7 = scmp.ne.s32.totalorder %s1478_s16, %s1054_s12  ;;  %s1059_s15 = sshll.u32 %s1345_s0, 4  ;;  %s1060_s15 = int_to_ptr.vmem [resolvable:$false] %s1059_s15 }
  0x32   : > { %s1061_s2 = scalar_lea.vmem %s1060_s15, 4096  ;;  %p1062_p3 = scmp.lt.s32.totalorder %s1478_s16, %s1060_s15 }
  0x33   : > { %p1057_p9 = pnand %p1055_p7, %p1955_p8  ;;  %p1063_p11 = scmp.lt.s32.totalorder %s1061_s2, %s1054_s12 }
  0x35   : > { %p1058_p0 = pneg %p1057_p9  ;;  %p1064_p12 = por %p1063_p11, %p1062_p3 }
  0x37   : > { %p1065_p13 = pnand %p1064_p12, %p1058_p0 }
  0x39   : > { %1068 = shalt.err (!%p1065_p13)
}
  0x3a   : > { %s1953_s27 = smov 256   ;;  %s1956_s7 = smov 128  }
  0x3b   : > { %s1958_s11 = smov 8   ;;  %p788_p0 = scmp.ge.s32.totalorder %s1343_s6, 1 }
  0x3c   : > { %904 = dma.hbm_to_vmem [thread:$0]  (!%p1487_p6), %s1483_s9, 2048, %s1478_s16, %s1500_s28, %s1953_s27, %s1956_s7, %s1958_s11  }
  0x3d   : > { %p329_p3 = scmp.lt.s32.totalorder %s1343_s6, 5  ;;  %s1541_s17 = sadd.s32 4294967295, %s1343_s6  }
  0x3e   : > { %s773_s9 = sadd.s32 4294967294, %s1343_s6   ;;  %s2001_s16 = sadd.s32 1, %s1335_s29 }
  0x3f   : > { %p1536_p4 = pnand %p788_p0, %p329_p3  ;;  %s2073_s16 = smov (%p1462_p1, %s2001_s16), 0 }
  0x40   : > { %2002 = sst [smem:[#allocation25_spill]] %s2073_s16  ;;  %s42_s12 = sadd.s32 1, %s1339_s30 }
  0x41   : > { %s2000_s13 = scalar_select %p1536_p4, 1, 0 }
  0x42   : > { %p1971_p10 = scmp.eq.s32.totalorder %s1541_s17, 0  ;;  %s2075_s12 = smov (!%p1462_p1, %s42_s12), %s1339_s30 }
  0x43   : > { %s1557_s0 = ssub.s32 %s1335_s29, %s2073_s16  ;;  %p2003_p2 = scmp.ne.s32.totalorder %s1307_s22, %s1303_s21 }
  0x44   : > { %p44_p7 = scmp.ge.s32.totalorder %s2075_s12, 2  ;;  %s137_s2 = sadd.s32 1, %s1299_s20 }
  0x45   : > { %p1564_p5 = por %p2003_p2, %p1971_p10  ;;  %p144_p11 = scmp.ne.s32.totalorder %s1299_s20, %s1295_s19 }
  0x46   : > { %s2077_s12 = smov (%p44_p7, %s2075_s12), 0  ;;  %p2007_p1 = scmp.eq.s32.totalorder %s1343_s6, 0 }
  0x47   : > { %s2004_s15 = scalar_select %p1564_p5, 1, 0 }
  0x48   : > { %2006 = sst [smem:[#allocation27_spill]] %s2077_s12  ;;  %p1576_p12 = por %p144_p11, %p2007_p1 }
  0x49   : > { %2005 = sst [smem:[#allocation26_spill]] %s2004_s15  ;;  %p150_p13 = scmp.ne.s32.totalorder %s1295_s19, %s1291_s18 }
  0x4a   : > { %s79_s8 = ssub.s32 %s1339_s30, %s2077_s12  ;;  %p202_p0 = scmp.eq.s32.totalorder %s1541_s17, 3 }
  0x4b   : > { %s80_s27 = sor.u32 %s79_s8, %s1557_s0  ;;  %p135_p3 = scmp.eq.s32.totalorder %s79_s8, 0 }
  0x4c   : > { %p81_p2 = scmp.eq.s32.totalorder %s80_s27, 0  ;;  %p1588_p8 = por %p150_p13, %p1971_p10 }
  0x4d   : > { %s1593_s11 = scalar_select %p135_p3, %s1299_s20, %s137_s2  }
  0x4e   : > { %s2009_s7 = scalar_select %p1588_p8, 1, 0 }
  0x4f   : > { %2011 = sst [smem:[#allocation29_spill]] %s1593_s11  ;;  %s2012_s1 = sadd.s32 1, %s1311_s23 }
  0x50   : > { %2010 = sst [smem:[#allocation28_spill]] %s2009_s7  ;;  %p1600_p7 = por %p202_p0, %p144_p11 }
  0x51   : > { %s1598_s16 = scalar_select %p81_p2, %s1311_s23, %s2012_s1  }
  0x52   : > { %s2014_s18 = scalar_select %p1600_p7, 1, 0 }
  0x53   : > { %2013 = sst [smem:[#allocation30_spill]] %s1598_s16  ;;  %p208_p1 = scmp.eq.s32.totalorder %s773_s9, 3 }
  0x54   : > { %s1968_s12 = sand.u32 1, %s1299_s20   ;;  %s786_s27 = sshll.u32 %s1339_s30, 4 }
  0x55   : > { %p1605_p9 = por %p208_p1, %p150_p13  ;;  %s300_s19 = scalar_lea.vmem [#allocation9], %s1968_s12 }
  0x56   : > { %s307_s15 = sshll.u32 %s300_s19, 4  ;;  %s2016_s3 = sld [smem:[#allocation35_spill]]  ;;  %s1617_s15 = int_to_ptr.vmem [resolvable:$true] %s307_s15 }
  0x57   : > { %s2015_s8 = scalar_select %p1605_p9, 1, 0 }
  0x58   : > { %p2017_p11 = scmp.lt.s32.totalorder %s1343_s6, 4  ;;  %s1630_s19 = scalar_lea.hbm %s1945_s4, %s786_s27 }
  0x59   : > { %s2019_s7 = sand.u32 1, %s1343_s6  }
  0x5a   : > { %p1623_p13 = pnand %p2017_p11, %p1576_p12  ;;  %s1634_s2 = scalar_lea.sflag [#allocation10], %s2019_s7 }
  0x5c   : > { %s1615_s11 = scalar_lea.hbm %s2016_s3, %s786_s27  ;;  %p1977_p3 = pneg %p1623_p13 }
  0x5d   : > { %s2018_s1 = scalar_select %p1623_p13, 1, 0 }
  0x5e   : > { %s1069_s30 = scalar_lea.hbm %s1615_s11, 16  ;;  %s1074_s23 = scalar_lea.hbm %s2016_s3, 32 }
  0x5f   : > { %p1070_p0 = scmp.ne.s32.totalorder %s1615_s11, %s1069_s30  ;;  %p1075_p1 = scmp.lt.u32.totalorder %s1615_s11, %s2016_s3 }
  0x60   : > { %p1076_p11 = scmp.lt.u32.totalorder %s1074_s23, %s1069_s30  ;;  %p1078_p9 = scmp.lt.u32.totalorder %s1069_s30, %s1615_s11 }
  0x61   : > { %p1072_p12 = pnand %p1977_p3, %p1070_p0 }
  0x62   : > { %p1077_p10 = por %p1076_p11, %p1075_p1 }
  0x63   : > { %p1073_p2 = pneg %p1072_p12 }
  0x64   : > { %p1079_p7 = por %p1078_p9, %p1077_p10 }
  0x66   : > { %p1080_p8 = pnand %p1079_p7, %p1073_p2 }
  0x68   : > { %1083 = shalt.err (!%p1080_p8)
}
  0x69   : > { %s1084_s27 = scalar_lea.vmem %s1617_s15, 16  ;;  %s1349_s16 = smov [#allocation9]  }
  0x6a   : > { %p1085_p0 = scmp.ne.s32.totalorder %s1617_s15, %s1084_s27  ;;  %s1089_s7 = sshll.u32 %s1349_s16, 4  ;;  %s1090_s7 = int_to_ptr.vmem [resolvable:$false] %s1089_s7 }
  0x6b   : > { %s1091_s21 = scalar_lea.vmem %s1090_s7, 32  ;;  %p1092_p4 = scmp.lt.s32.totalorder %s1617_s15, %s1090_s7 }
  0x6c   : > { %p1087_p12 = pnand %p1085_p0, %p1977_p3  ;;  %p1093_p1 = scmp.lt.s32.totalorder %s1091_s21, %s1084_s27 }
  0x6e   : > { %p1088_p5 = pneg %p1087_p12  ;;  %p1094_p11 = por %p1093_p1, %p1092_p4 }
  0x70   : > { %p1095_p10 = pnand %p1094_p11, %p1088_p5 }
  0x72   : > { %1098 = shalt.err (!%p1095_p10)
}
  0x73   : > { %910 = dma.hbm_to_vmem [thread:$0]  (!%p1623_p13), %s1615_s11, 16, %s1617_s15, %s1634_s2  }
  0x74   : > { %s55_s23 = sadd.s32 1, %s1323_s26  ;;  %p62_p8 = scmp.ne.s32.totalorder %s1323_s26, %s1319_s25 }
  0x75   : > { %p2020_p4 = scmp.eq.s32.totalorder %s1557_s0, 0  ;;  %p2022_p5 = scmp.eq.s32.totalorder %s1343_s6, 0 }
  0x76   : > { %p68_p7 = scmp.ne.s32.totalorder %s1319_s25, %s1315_s24  ;;  %s228_s12 = sand.u32 1, %s1323_s26  }
  0x77   : > { %s1668_s30 = scalar_select %p2020_p4, %s1323_s26, %s55_s23  }
  0x78   : > { %p64_p9 = por %p2022_p5, %p62_p8  ;;  %s777_s9 = sshll.u32 %s1335_s29, 7 }
  0x79   : > { %2021 = sst [smem:[#allocation31_spill]] %s1668_s30  ;;  %p2023_p2 = scmp.eq.s32.totalorder %s1541_s17, 0 }
  0x7a   : > { %s776_s16 = sshll.u32 %s228_s12, 4  ;;  %s2025_s3 = sld [smem:[#allocation32_spill]] }
  0x7b   : > { %p1678_p0 = por %p2023_p2, %p68_p7  ;;  %p2026_p12 = scmp.lt.s32.totalorder %s1343_s6, 4 }
  0x7c   : > { %s232_s24 = scalar_lea.vmem [#allocation3], %s776_s16  ;;  %s2028_s23 = sand.u32 1, %s1299_s20  }
  0x7d   : > { %s2024_s27 = scalar_select %p1678_p0, 1, 0 }
  0x7e   : > { %p1689_p1 = pnand %p2026_p12, %p64_p9  ;;  %s241_s15 = sshll.u32 %s232_s24, 4  ;;  %s1698_s15 = int_to_ptr.vmem [resolvable:$true] %s241_s15 }
  0x7f   : > { %s1695_s29 = scalar_lea.vmem [#allocation11], %s2028_s23 }
  0x80   : > { %s1685_s11 = scalar_lea.hbm %s2025_s3, %s777_s9  ;;  %s1700_s9 = scalar_lea.sflag [#allocation4], %s228_s12 }
  0x81   : > { %s1099_s21 = scalar_lea.hbm %s1685_s11, 256  ;;  %p1101_p10 = pneg %p1689_p1 }
  0x82   : > { %p1100_p11 = scmp.ne.s32.totalorder %s1685_s11, %s1099_s21  ;;  %s1104_s24 = scalar_lea.hbm %s2025_s3, 512 }
  0x83   : > { %p1105_p5 = scmp.lt.u32.totalorder %s1685_s11, %s2025_s3  ;;  %p1106_p9 = scmp.lt.u32.totalorder %s1104_s24, %s1099_s21 }
  0x84   : > { %p1102_p8 = pnand %p1101_p10, %p1100_p11  ;;  %p1108_p2 = scmp.lt.u32.totalorder %s1099_s21, %s1685_s11 }
  0x85   : > { %p1107_p7 = por %p1106_p9, %p1105_p5 }
  0x86   : > { %p1103_p4 = pneg %p1102_p8 }
  0x87   : > { %p1109_p12 = por %p1108_p2, %p1107_p7 }
  0x89   : > { %p1110_p3 = pnand %p1109_p12, %p1103_p4 }
  0x8b   : > { %1113 = shalt.err (!%p1110_p3)
}
  0x8c   : > { %s1114_s12 = scalar_lea.vmem %s1698_s15, 256  ;;  %s1350_s30 = smov [#allocation3]  }
  0x8d   : > { %p1115_p11 = scmp.ne.s32.totalorder %s1698_s15, %s1114_s12  ;;  %s1119_s16 = sshll.u32 %s1350_s30, 4  ;;  %s1120_s16 = int_to_ptr.vmem [resolvable:$false] %s1119_s16 }
  0x8e   : > { %s1121_s26 = scalar_lea.vmem %s1120_s16, 512  ;;  %p1122_p13 = scmp.lt.s32.totalorder %s1698_s15, %s1120_s16 }
  0x8f   : > { %p1117_p8 = pnand %p1115_p11, %p1101_p10  ;;  %p1123_p5 = scmp.lt.s32.totalorder %s1121_s26, %s1114_s12 }
  0x91   : > { %p1118_p0 = pneg %p1117_p8  ;;  %p1124_p9 = por %p1123_p5, %p1122_p13 }
  0x93   : > { %p1125_p7 = pnand %p1124_p9, %p1118_p0 }
  0x95   : > { %1128 = shalt.err (!%p1125_p7)
}
  0x96   : > { %s2029_s21 = smov 8   ;;  %s2030_s24 = smov 128  }
  0x97   : > { %s2031_s23 = smov 256   ;;  %s1129_s30 = scalar_lea.hbm %s1494_s14, 2048 }
  0x98   : > { %901 = dma.hbm_to_vmem [thread:$0]  (!%p1689_p1), %s1685_s11, 256, %s1698_s15, %s1700_s9, %s2031_s23, %s2030_s24, %s2029_s21  }
  0x99   : > { %p1130_p3 = scmp.ne.s32.totalorder %s1494_s14, %s1129_s30  ;;  %p2032_p13 = pneg %p1487_p6 }
  0x9a   : > { %s2033_s16 = sld [smem:[#allocation34_spill]]  ;;  %p1138_p11 = scmp.lt.u32.totalorder %s1129_s30, %s1494_s14 }
  0x9b   : > { %p1132_p0 = pnand %p1130_p3, %p2032_p13 }
  0x9d   : > { %p1133_p10 = pneg %p1132_p0 }
  0xa0   : > { %s1134_s26 = scalar_lea.hbm %s2033_s16, 8192  ;;  %p1135_p4 = scmp.lt.u32.totalorder %s1494_s14, %s2033_s16 }
  0xa1   : > { %p1136_p2 = scmp.lt.u32.totalorder %s1134_s26, %s1129_s30 }
  0xa3   : > { %p1137_p12 = por %p1136_p2, %p1135_p4 }
  0xa5   : > { %p1139_p8 = por %p1138_p11, %p1137_p12 }
  0xa7   : > { %p1140_p5 = pnand %p1139_p8, %p1133_p10 }
  0xa9   : > { %1143 = shalt.err (!%p1140_p5)
}
  0xaa   : > { %s1144_s11 = scalar_lea.vmem %s1532_s5, 2048  ;;  %p2034_p9 = pmov %p2032_p13 }
  0xab   : > { %p1145_p1 = scmp.ne.s32.totalorder %s1532_s5, %s1144_s11  ;;  %s1351_s15 = smov [#allocation8]  }
  0xac   : > { %s1149_s9 = sshll.u32 %s1351_s15, 4  ;;  %s1150_s9 = int_to_ptr.vmem [resolvable:$false] %s1149_s9 }
  0xad   : > { %p1147_p7 = pnand %p1145_p1, %p2034_p9  ;;  %s1151_s3 = scalar_lea.vmem %s1150_s9, 4096 }
  0xae   : > { %p1152_p13 = scmp.lt.s32.totalorder %s1532_s5, %s1150_s9  ;;  %p1153_p0 = scmp.lt.s32.totalorder %s1151_s3, %s1144_s11 }
  0xaf   : > { %p1148_p3 = pneg %p1147_p7 }
  0xb0   : > { %p1154_p4 = por %p1153_p0, %p1152_p13 }
  0xb2   : > { %p1155_p2 = pnand %p1154_p4, %p1148_p3 }
  0xb4   : > { %1158 = shalt.err (!%p1155_p2)
}
  0xb5   : > { %907 = dma.hbm_to_vmem [thread:$0]  (!%p1487_p6), %s1494_s14, 2048, %s1532_s5, %s1500_s28, %s2031_s23, %s2030_s24, %s2029_s21  }
  0xb6   : > { %s2035_s7 = sshll.u32 %s1695_s29, 4  ;;  %s1159_s30 = scalar_lea.hbm %s1630_s19, 16  ;;  %s325_s7 = int_to_ptr.vmem [resolvable:$true] %s2035_s7 }
  0xb7   : > { %p1160_p10 = scmp.ne.s32.totalorder %s1630_s19, %s1159_s30  ;;  %p2036_p12 = scmp.ne.s32.totalorder %s2018_s1, 0 }
  0xb8   : > { %s1164_s0 = scalar_lea.hbm %s1945_s4, 32  ;;  %p1165_p1 = scmp.lt.u32.totalorder %s1630_s19, %s1945_s4 }
  0xb9   : > { %p2037_p11 = pneg %p2036_p12  ;;  %p1166_p9 = scmp.lt.u32.totalorder %s1164_s0, %s1159_s30 }
  0xba   : > { %p1168_p3 = scmp.lt.u32.totalorder %s1159_s30, %s1630_s19 }
  0xbb   : > { %p1162_p8 = pnand %p1160_p10, %p2037_p11  ;;  %p1167_p7 = por %p1166_p9, %p1165_p1 }
  0xbd   : > { %p1163_p5 = pneg %p1162_p8  ;;  %p1169_p6 = por %p1168_p3, %p1167_p7 }
  0xbf   : > { %p1170_p13 = pnand %p1169_p6, %p1163_p5 }
  0xc1   : > { %1173 = shalt.err (!%p1170_p13)
}
  0xc2   : > { %s1174_s28 = scalar_lea.vmem %s325_s7, 16  ;;  %p2038_p4 = pmov %p2037_p11 }
  0xc3   : > { %p1175_p0 = scmp.ne.s32.totalorder %s325_s7, %s1174_s28  ;;  %s1352_s29 = smov [#allocation11]  }
  0xc4   : > { %s1179_s14 = sshll.u32 %s1352_s29, 4  ;;  %s1180_s14 = int_to_ptr.vmem [resolvable:$false] %s1179_s14 }
  0xc5   : > { %p1177_p2 = pnand %p1175_p0, %p2038_p4  ;;  %s1181_s5 = scalar_lea.vmem %s1180_s14, 32 }
  0xc6   : > { %p1182_p11 = scmp.lt.s32.totalorder %s325_s7, %s1180_s14  ;;  %p1183_p8 = scmp.lt.s32.totalorder %s1181_s5, %s1174_s28 }
  0xc7   : > { %p1178_p10 = pneg %p1177_p2 }
  0xc8   : > { %p1184_p1 = por %p1183_p8, %p1182_p11 }
  0xca   : > { %p1185_p9 = pnand %p1184_p1, %p1178_p10 }
  0xcc   : > { %1188 = shalt.err (!%p1185_p9)
}
  0xcd   : > { %913 = dma.hbm_to_vmem [thread:$0]  (!%p2036_p12), %s1630_s19, 16, %s325_s7, %s1634_s2  }
  0xce   : > { %p2039_p5 = scmp.ne.s32.totalorder %s2000_s13, 0 }
  0xcf   : > { %s335_s21 = sand.u32 (!%p2039_p5), 1, %s1319_s25   ;;  %p2040_p7 = scmp.ne.s32.totalorder (!%p2039_p5), %s2024_s27, 0 }
  0xd0   : > { %333 = sbr.rel (%p2039_p5) target bundleno = 545 (0x221), region = 40  ;;  %s1783_s24 = sshll.u32 (!%p2039_p5), %s335_s21, 4 }
  0xd1   : > { %s336_s23 = scalar_lea.sflag (!%p2039_p5), [#allocation4], %s335_s21  ;;  %s339_s11 = scalar_lea.vmem (!%p2039_p5), [#allocation3], %s1783_s24 }
  0xd7   : > { %1274 = dma.done.wait (%p2040_p7), %s336_s23, 256  }
  0xd8   : > { %1276 = vsyncadd (%p2040_p7), %s336_s23, 4294967040  ;;  %s2041_s1 = sld [smem:[#allocation26_spill]]  ;;  %s344_s19 = sand.u32 1, %s1541_s17  }
  0xd9   : > { %s346_s2 = sand.u32 1, %s1307_s22   ;;  %s345_s15 = scalar_lea.sflag [#allocation7], %s344_s19 }
  0xda   : > { %s790_s13 = sshll.u32 %s346_s2, 7 }
  0xdb   : > { %s1792_s9 = scalar_lea.vmem [#allocation6], %s790_s13 }
  0xde   : > { %p2042_p12 = scmp.ne.s32.totalorder %s2041_s1, 0 }
  0xe0   : > { %1278 = dma.done.wait (%p2042_p12), %s345_s15, 4096  }
  0xe1   : > { %1280 = vsyncadd (%p2042_p12), %s345_s15, 4294963200  ;;  %s2043_s3 = sld [smem:[#allocation18_spill]]  ;;  %s2044_s7 = sld [smem:[#allocation28_spill]] }
  0xe2   : > { %s1801_s27 = scalar_lea.vmem [#allocation8], %s790_s13  ;;  %s363_s10 = scalar_lea.sflag [#allocation10], %s344_s19 }
  0xe7   : > { %s1799_s30 = sand.u32 1, %s2043_s3   ;;  %p2045_p3 = scmp.ne.s32.totalorder %s2044_s7, 0 }
  0xe8   : > { %s365_s12 = scalar_lea.vmem [#allocation9], %s1799_s30 }
  0xe9   : > { %1282 = dma.done.wait (%p2045_p3), %s363_s10, 32  }
  0xea   : > { %1284 = vsyncadd (%p2045_p3), %s363_s10, 4294967264  ;;  %s792_s17 = sshll.u32 %s1799_s30, 4  ;;  %s373_s0 = scalar_lea.vmem [#allocation11], %s1799_s30 }
  0xeb   : > { %s1810_s16 = scalar_lea.vmem [#allocation12], %s792_s17  ;;  %s2046_s26 = sld [smem:[#allocation21_spill]] }
  0xf1   : > { %p793_p6 = scmp.ne.s32.totalorder %s2046_s26, 0 }
  0xf2   : > { %v1353_v0 = vmov (!%p793_p6), 0.0  }
  0xf3   : > { %425 = sbr.rel (%p793_p6) target bundleno = 250 (0xfa), region = 64  ;;  %426 = vst [vmem:[#allocation2] sm:$0xff] (!%p793_p6), %v1353_v0  ;;  %427 = vst [vmem:[#allocation2 + $0x8] sm:$0xff] (!%p793_p6), %v1353_v0 }
  0xfa PF: > { %v428_v1 = vld [vmem:[%s1792_s9] sm:$0xff]  ;;  %v429_v2 = vld [vmem:[%s1792_s9 + $0x8] sm:$0xff]  ;;  %v430_v6 = vld [vmem:[%s1792_s9 + $0x10] sm:$0xff]  ;;  %s2047_s28 = sld [smem:[#allocation21_spill]] }
  0xfb   : > { %v444_v3 = vld [vmem:[%s1801_s27] sm:$0xff]  ;;  %v445_v4 = vld [vmem:[%s1801_s27 + $0x8] sm:$0xff]  ;;  %v431_v7 = vld [vmem:[%s1792_s9 + $0x18] sm:$0xff] }
  0xfc   : > { %v460_v5 = vmul.f32 %v444_v3, %v428_v1  ;;  %v461_v8 = vmul.f32 %v445_v4, %v429_v2  ;;  %v446_v9 = vld [vmem:[%s1801_s27 + $0x10] sm:$0xff]  ;;  %v447_v10 = vld [vmem:[%s1801_s27 + $0x18] sm:$0xff]  ;;  %v432_v11 = vld [vmem:[%s1792_s9 + $0x20] sm:$0xff] }
  0xfd   : > { %v462_v12 = vmul.f32 %v446_v9, %v430_v6  ;;  %v463_v13 = vmul.f32 %v447_v10, %v431_v7  ;;  %v433_v14 = vld [vmem:[%s1792_s9 + $0x28] sm:$0xff]  ;;  %v448_v15 = vld [vmem:[%s1801_s27 + $0x20] sm:$0xff]  ;;  %v434_v20 = vld [vmem:[%s1792_s9 + $0x30] sm:$0xff] }
  0xfe   : > { %v449_v16 = vld [vmem:[%s1801_s27 + $0x28] sm:$0xff]  ;;  %v854_v17 = vpack.c.bf16 %v461_v8, %v460_v5  ;;  %v464_v18 = vmul.f32 %v448_v15, %v432_v11  ;;  %v435_v22 = vld [vmem:[%s1792_s9 + $0x38] sm:$0xff]  ;;  %v450_v23 = vld [vmem:[%s1801_s27 + $0x30] sm:$0xff] }
  0xff   : > { %v465_v19 = vmul.f32 %v449_v16, %v433_v14  ;;  %v858_v21 = vpack.c.bf16 %v463_v13, %v462_v12  ;;  %v451_v24 = vld [vmem:[%s1801_s27 + $0x38] sm:$0xff]  ;;  %v466_v26 = vmul.f32 %v450_v23, %v434_v20  ;;  %v436_v28 = vld [vmem:[%s1792_s9 + $0x40] sm:$0xff]  ;;  %v437_v29 = vld [vmem:[%s1792_s9 + $0x48] sm:$0xff] }
 0x100   : > { %855 = vmatprep.subr.bf16.mxu0 %v854_v17  ;;  %v467_v27 = vmul.f32 %v451_v24, %v435_v22  ;;  %v452_v30 = vld [vmem:[%s1801_s27 + $0x40] sm:$0xff]  ;;  %v453_v31 = vld [vmem:[%s1801_s27 + $0x48] sm:$0xff]  ;;  %v438_v36 = vld [vmem:[%s1792_s9 + $0x50] sm:$0xff]  ;;  %p794_p13 = scmp.ne.s32.totalorder %s2047_s28, 1 }
 0x101   : > { %857 = vmatpush3.bf16.msra.mxu0 %v854_v17  ;;  %v862_v25 = vpack.c.bf16 %v465_v19, %v464_v18  ;;  %v478_v32 = vld [vmem:[%s339_s11] sm:$0xff]  ;;  %v468_v34 = vmul.f32 %v452_v30, %v436_v28  ;;  %v469_v35 = vmul.f32 %v453_v31, %v437_v29  ;;  %v439_v37 = vld [vmem:[%s1792_s9 + $0x58] sm:$0xff]  ;;  %v441_v44 = vld [vmem:[%s1792_s9 + $0x68] sm:$0xff]  ;;  %v572_v3 = vlaneseq (!%p794_p13) }
 0x102   : > { %859 = vmatprep.subr.bf16.mxu0 %v858_v21  ;;  %851 = vmatprep.mubr.f32.mxu0 %v478_v32  ;;  %v866_v33 = vpack.c.bf16 %v467_v27, %v466_v26  ;;  %v454_v38 = vld [vmem:[%s1801_s27 + $0x50] sm:$0xff]  ;;  %v455_v39 = vld [vmem:[%s1801_s27 + $0x58] sm:$0xff]  ;;  %v440_v43 = vld [vmem:[%s1792_s9 + $0x60] sm:$0xff] }
 0x103   : > { %v870_v40 = vpack.c.bf16 %v469_v35, %v468_v34  ;;  %v470_v41 = vmul.f32 %v454_v38, %v438_v36  ;;  %v471_v42 = vmul.f32 %v455_v39, %v439_v37  ;;  %v456_v45 = vld [vmem:[%s1801_s27 + $0x60] sm:$0xff]  ;;  %v457_v46 = vld [vmem:[%s1801_s27 + $0x68] sm:$0xff]  ;;  %v442_v50 = vld [vmem:[%s1792_s9 + $0x70] sm:$0xff]  ;;  %v573_v7 = vshrl.u32 (!%p794_p13), %v572_v3, 7 }
 0x104   : > { %v472_v48 = vmul.f32 %v456_v45, %v440_v43  ;;  %v473_v49 = vmul.f32 %v457_v46, %v441_v44  ;;  %v443_v51 = vld [vmem:[%s1792_s9 + $0x78] sm:$0xff]  ;;  %v458_v52 = vld [vmem:[%s1801_s27 + $0x70] sm:$0xff] }
 0x105   : > { %861 = vmatpush3.bf16.msra.mxu0 %v858_v21  ;;  %v874_v47 = vpack.c.bf16 %v471_v42, %v470_v41  ;;  %v459_v53 = vld [vmem:[%s1801_s27 + $0x78] sm:$0xff]  ;;  %v474_v55 = vmul.f32 %v458_v52, %v442_v50  ;;  %v476_v60 = vld [vmem:[#allocation2] sm:$0xff]  ;;  %v574_v10 = vsub.s32 (!%p794_p13), 0, %v573_v7 }
 0x106   : > { %863 = vmatprep.subr.bf16.mxu0 %v862_v25  ;;  %v878_v54 = vpack.c.bf16 %v473_v49, %v472_v48  ;;  %v475_v56 = vmul.f32 %v459_v53, %v443_v51  ;;  %v479_v58 = vld [vmem:[%s339_s11 + $0x8] sm:$0xff]  ;;  %v567_v1 = vld [vmem:[%s365_s12] sm:$0x1] (!%p794_p13) }
 0x107   : > { %v477_v59 = vld [vmem:[#allocation2 + $0x8] sm:$0xff]  ;;  %v568_v2 = vld [vmem:[%s373_s0] sm:$0x1] (!%p794_p13) }
 0x108   : > { %v882_v57 = vpack.c.bf16 %v475_v56, %v474_v55  ;;  %v569_v5 = vmul.f32 (!%p794_p13), %v568_v2, %v567_v1 }
 0x109   : > { %865 = vmatpush3.bf16.msra.mxu0 %v862_v25 }
 0x10a   : > { %867 = vmatprep.subr.bf16.mxu0 %v866_v33  ;;  %v570_v8 = vmul.f32 (!%p794_p13), 1.25, %v569_v5 }
 0x10c   : > { %v575_v12 = vrot.slane (!%p794_p13), %v570_v8, %v574_v10 }
 0x10d   : > { %869 = vmatpush3.bf16.msra.mxu0 %v866_v33 }
 0x10e   : > { %871 = vmatprep.subr.bf16.mxu0 %v870_v40 }
 0x111   : > { %873 = vmatpush3.bf16.msra.mxu0 %v870_v40 }
 0x112   : > { %875 = vmatprep.subr.bf16.mxu0 %v874_v47 }
 0x115   : > { %877 = vmatpush3.bf16.msra.mxu0 %v874_v47 }
 0x116   : > { %879 = vmatprep.subr.bf16.mxu0 %v878_v54 }
 0x119   : > { %881 = vmatpush3.bf16.msra.mxu0 %v878_v54 }
 0x11a   : > { %883 = vmatprep.subr.bf16.mxu0 %v882_v57 }
 0x11d   : > { %885 = vmatpush3.bf16.msra.mxu0 %v882_v57 }
 0x120   : > { %852 = vmatmul.mubr.f32.vlgmr.msra.gmra.mrb[0].mxu0 %v479_v58 }
 0x1f1   : > { %562 = sbr.rel (%p794_p13) target bundleno = 516 (0x204), region = 68 }
 0x1f3   : > { %v853_v61 = vpop.f32.mrb[0].mxu0 }
 0x1f4   : > { %v556_v62 = vadd.f32 %v853_v61, %v477_v59  ;;  %v546_v63 = vpop.f32.mrb[1].mxu0 }
 0x1f5   : > { %v555_v0 = vadd.f32 %v546_v63, %v476_v60 }
 0x1f6   : > { %558 = vst [vmem:[#allocation2 + $0x8] sm:$0xff] %v556_v62 }
 0x1f7   : > { %557 = vst [vmem:[#allocation2] sm:$0xff] %v555_v0 }
 0x1fd   : > { %v564_v6 = vld [vmem:[#allocation2 + $0x8] sm:$0xff] }
 0x1fe   : > { %v563_v4 = vld [vmem:[#allocation2] sm:$0xff]  ;;  %v566_v11 = vmul.f32 1.25, %v564_v6 }
 0x1ff   : > { %v565_v9 = vmul.f32 1.25, %v563_v4 }
 0x200   : > { %v578_v14 = vadd.f32 %v575_v12, %v566_v11 }
 0x201   : > { %v577_v13 = vadd.f32 %v575_v12, %v565_v9 }
 0x202   : > { %580 = vst [vmem:[%s1810_s16 + $0x8] sm:$0xff] %v578_v14 }
 0x203   : > { %579 = vst [vmem:[%s1810_s16] sm:$0xff] %v577_v13 }
 0x204 PF: > { %s2048_s29 = sld [smem:[#allocation22_spill]]  ;;  %s2049_s24 = sld [smem:[#allocation36_spill]] }
 0x205   : > { %s597_s1 = sshll.u32 %s1810_s16, 4  ;;  %s582_s19 = scalar_lea.sflag [#allocation5], %s1799_s30  ;;  %s1863_s1 = int_to_ptr.vmem [resolvable:$true] %s597_s1 }
 0x206   : > { %s1189_s2 = scalar_lea.vmem %s1863_s1, 256  ;;  %p2051_p4 = scmp.ne.s32.totalorder %s2014_s18, 0 }
 0x207   : > { %p1190_p0 = scmp.ne.s32.totalorder %s1863_s1, %s1189_s2  ;;  %s1354_s13 = smov [#allocation12]  }
 0x208   : > { %s1193_s15 = sshll.u32 %s1354_s13, 4  ;;  %s1194_s15 = int_to_ptr.vmem [resolvable:$false] %s1193_s15 }
 0x209   : > { %p1191_p2 = pnand %p1190_p0, %p2051_p4  ;;  %s1195_s9 = scalar_lea.vmem %s1194_s15, 512 }
 0x20a   : > { %s796_s14 = sshll.u32 %s2048_s29, 7  ;;  %s2050_s11 = smov %s2049_s24 }
 0x20b   : > { %s1860_s23 = scalar_lea.hbm %s2049_s24, %s796_s14  ;;  %p1192_p10 = pneg %p1191_p2 }
 0x20c   : > { %p1196_p11 = scmp.lt.s32.totalorder %s1863_s1, %s1194_s15  ;;  %p1197_p8 = scmp.lt.s32.totalorder %s1195_s9, %s1189_s2 }
 0x20e   : > { %p1198_p1 = por %p1197_p8, %p1196_p11 }
 0x210   : > { %p1199_p9 = pnand %p1198_p1, %p1192_p10 }
 0x212   : > { %1202 = shalt.err (!%p1199_p9)
}
 0x213   : > { %s1203_s3 = scalar_lea.hbm %s1860_s23, 256  ;;  %s1207_s10 = scalar_lea.hbm %s2050_s11, 512 }
 0x214   : > { %p1204_p5 = scmp.ne.s32.totalorder %s1860_s23, %s1203_s3  ;;  %p1208_p3 = scmp.lt.u32.totalorder %s1860_s23, %s2050_s11 }
 0x215   : > { %p1209_p6 = scmp.lt.u32.totalorder %s1207_s10, %s1203_s3  ;;  %p1211_p0 = scmp.lt.u32.totalorder %s1203_s3, %s1860_s23 }
 0x216   : > { %p1205_p7 = pnand %p1204_p5, %p2051_p4 }
 0x217   : > { %p1210_p13 = por %p1209_p6, %p1208_p3 }
 0x218   : > { %p1206_p12 = pneg %p1205_p7 }
 0x219   : > { %p1212_p2 = por %p1211_p0, %p1210_p13 }
 0x21b   : > { %p1213_p10 = pnand %p1212_p2, %p1206_p12 }
 0x21d   : > { %1216 = shalt.err (!%p1213_p10)
}
 0x21e   : > { %s1355_s0 = smov 128   ;;  %s1356_s16 = smov 256  }
 0x21f   : > { %s1357_s26 = smov 8  }
 0x220   : > { %896 = dma.vmem_to_hbm [thread:$0]  (%p2051_p4), %s1863_s1, 256, %s1860_s23, %s582_s19, %s1355_s0, %s1356_s16, %s1357_s26  }
 0x221 PF: > { %s2052_s28 = sld [smem:[#allocation17_spill]]  ;;  %p919_p11 = scmp.ge.s32.totalorder %s1343_s6, 2 }
 0x222   : > { %p2053_p8 = scmp.ne.s32.totalorder %s2015_s8, 0 }
 0x224   : > { %p915_p1 = pnand %p919_p11, %p2053_p8 }
 0x227   : > { %s612_s29 = sand.u32 1, %s2052_s28  }
 0x228   : > { %s613_s14 = scalar_lea.sflag [#allocation5], %s612_s29 }
 0x229   : > { %1286 = dma.done.wait (!%p915_p1), %s613_s14, 256  }
 0x22a   : > { %1288 = vsyncadd (!%p915_p1), %s613_s14, 4294967040  ;;  %s27_s6 = sadd.s32 1, %s1343_s6   ;;  %s2055_s18 = sld [smem:[#allocation18_spill]] }
 0x22b   : > { %p1894_p9 = scmp.ge.s32.totalorder %s27_s6, 6   ;;  %s2056_s30 = sld [smem:[#allocation29_spill]] }
 0x22c   : > { %s2057_s24 = sld [smem:[#allocation19_spill]]  ;;  %s2058_s23 = sld [smem:[#allocation30_spill]] }
 0x22d   : > { %s2059_s1 = sld [smem:[#allocation20_spill]]  ;;  %s2060_s26 = sld [smem:[#allocation31_spill]] }
 0x22e   : > { %s2061_s27 = sld [smem:[#allocation23_spill]]  ;;  %s2062_s28 = sld [smem:[#allocation24_spill]] }
 0x22f   : > { %s2063_s29 = sld [smem:[#allocation25_spill]]  ;;  %s2064_s8 = sld [smem:[#allocation27_spill]] }
 0x230   : > { %s2065_s19 = smov %s1299_s20  ;;  %s2067_s21 = smov %s1307_s22 }
 0x231   : > { %s2066_s20 = smov %s2056_s30  ;;  %26 = sbr.rel (!%p1894_p9) target bundleno = 20 (0x14), region = 141 }
 0x232   : > { %s2068_s22 = smov %s2057_s24  ;;  %s2069_s24 = smov %s1319_s25 }
 0x233   : > { %s2070_s25 = smov %s2059_s1 }
 0x235   : > { %s2071_s30 = smov %s2064_s8 }
 0x238   :  { %618 = vsyncpa [#allocation4], 1 }
 0x239   :  { %620 = vsyncpa [#allocation4 + $0x1], 1 }
 0x23a   :  { %621 = vsyncpa [#allocation7], 1 }
 0x23b   :  { %623 = vsyncpa [#allocation7 + $0x1], 1 }
 0x23c   :  { %624 = vsyncpa [#allocation10], 1 }
 0x23d   :  { %626 = vsyncpa [#allocation10 + $0x1], 1 }
 0x23e   :  { %627 = vsyncpa [#allocation5], 1 }
 0x23f   :  { %629 = vsyncpa [#allocation5 + $0x1], 1 }

</bundles_post_ra>
